<compile_context>
chip_gen: v7x
topology: tpu7x:2x2x1
jax: 0.10.0
libtpu: 0.0.40
codegen_flags: <defaults>
</compile_context>

<pallas_src>
import math

import jax
import jax.numpy as jnp
from jax.experimental import pallas as pl
from jax.experimental.pallas import tpu as pltpu


def _round_up(v, m):
    return ((v + m - 1) // m) * m


def _make_critic_kernel(num_layers, last_is_vpu, compute_dtype, precision):
    """Fused MLP kernel.

    Layer 0 consumes the natural (batch_tile, d_in) x tile and produces a
    lane-major (h1, batch_tile) activation by contracting the feature dim of
    both operands on the MXU.  Hidden layers: h <- relu(W_i^T @ h + b_i) with
    f32 accumulation.  Final 1-wide layer: f32 VPU multiply + sublane reduce.
    """

    def kernel(*refs):
        # refs = (x_ref, w0, b0, w1, b1, ..., w_{L-1}, b_{L-1}, out_ref)
        x_ref, out_ref = refs[0], refs[-1]
        wb = refs[1:-1]

        h = x_ref[...]                                   # (batch_tile, d_in)
        if h.dtype != compute_dtype:
            h = h.astype(compute_dtype)
        lane_major = False                               # h is (feat, lanes)?

        for i in range(num_layers):
            w = wb[2 * i][...]
            b = wb[2 * i + 1][...]                       # f32 column vector
            is_last = i == num_layers - 1
            if is_last and last_is_vpu:
                # w: (in_last, 1) broadcasts over lanes; VPU mul + sublane
                # reduce -- the MXU never produces a 1-lane result.
                acc = jnp.sum(h.astype(jnp.float32) * w, axis=0, keepdims=True)
                h = acc + b                              # (1, batch_tile)
            else:
                if lane_major:
                    # (out_i, in_i) @ (in_i, batch_tile)
                    acc = jnp.dot(w, h, preferred_element_type=jnp.float32,
                                  precision=precision)
                else:
                    # Fold the batch-major -> lane-major flip into the matmul:
                    # contract dim 1 of w (out_i, in_i) with dim 1 of h
                    # (batch_tile, in_i) -> (out_i, batch_tile).
                    acc = jax.lax.dot_general(
                        w, h, (((1,), (1,)), ((), ())),
                        preferred_element_type=jnp.float32,
                        precision=precision)
                    lane_major = True
                h = acc + b                              # f32
                if not is_last:
                    h = jnp.maximum(h, 0.0)              # ReLU in f32 (v5e-safe)
                    if compute_dtype != jnp.float32:
                        h = h.astype(compute_dtype)
        out_ref[...] = h.astype(out_ref.dtype)

    return kernel


def prepare_critic_params(weights, biases, *, compute_dtype=jnp.float32):
    """One-time parameter prep, hoisted out of the per-call forward path.

    weights[i]: (net_size[i], net_size[i+1])  (torch weight.T)
    biases[i]:  (net_size[i+1],)
    """
    num_layers = len(weights)
    d_in = int(weights[0].shape[0])
    d_out = int(weights[-1].shape[1])
    last_is_vpu = (d_out == 1) and (num_layers > 1)

    w_prep, b_prep = [], []
    for i in range(num_layers):
        w = jnp.asarray(weights[i])
        b = jnp.reshape(jnp.asarray(biases[i]), (-1, 1)).astype(jnp.float32)
        if i == num_layers - 1 and last_is_vpu:
            w_prep.append(w.astype(jnp.float32).reshape(-1, 1))    # (in_last, 1)
            b_prep.append(b.reshape(1, 1))
        else:
            w_prep.append(w.T.astype(compute_dtype))               # (out_i, in_i)
            b_prep.append(b)                                       # (out_i, 1)
    return {
        "weights": tuple(w_prep),
        "biases": tuple(b_prep),
        "d_in": d_in,
        "d_out": d_out,
        "last_is_vpu": last_is_vpu,
        "compute_dtype": compute_dtype,
    }


def _num_tensorcores():
    # v7x has 2 TensorCores per chip; v4 / v5p megacore also shard a "parallel"
    # grid axis across 2 cores.  v5e / v6e have 1.
    try:
        kind = jax.devices()[0].device_kind.lower()
    except Exception:
        return 1
    if "v7" in kind or "v4" in kind or "v5p" in kind:
        return 2
    return 1


def _pick_batch_tile(batch, compute_dtype, num_tc):
    # Keep the live lane-major activation set well inside the 64x4KiB vreg
    # file: f32 tiles capped at 256 lanes, sub-32-bit dtypes at 512.
    cap = 256 if jnp.dtype(compute_dtype).itemsize >= 4 else 512
    if num_tc >= 2 and batch > 128:
        tile = _round_up(pl.cdiv(batch, 2), 128)   # >=2 parallel steps
    else:
        tile = _round_up(batch, 128)               # single step on 1-TC chips
    return max(128, min(tile, cap))


def _estimate_vmem_bytes(prepared, x_dtype, out_dtype, batch_tile):
    pbytes = sum(math.prod(a.shape) * a.dtype.itemsize
                 for a in (*prepared["weights"], *prepared["biases"]))
    x_tile = batch_tile * prepared["d_in"] * jnp.dtype(x_dtype).itemsize
    o_rows = 1 if prepared["last_is_vpu"] else prepared["d_out"]
    o_tile = batch_tile * o_rows * jnp.dtype(out_dtype).itemsize
    # Every spec (resident params included) is double-buffered by the pipeline.
    return 2 * (pbytes + x_tile + o_tile)


def critic_forward(x, prepared, *, batch_tile=None, precision=None):
    """Critic MLP forward as one fused Pallas kernel.

    x:        (B, d_in)
    prepared: output of prepare_critic_params()
    returns:  (B, d_out) in x.dtype
    """
    w_prep = prepared["weights"]
    b_prep = prepared["biases"]
    d_in = prepared["d_in"]
    d_out = prepared["d_out"]
    last_is_vpu = prepared["last_is_vpu"]
    compute_dtype = prepared["compute_dtype"]
    num_layers = len(w_prep)

    B = x.shape[0]
    assert x.shape[1] == d_in, (x.shape, d_in)

    num_tc = _num_tensorcores()
    if batch_tile is None:
        batch_tile = _pick_batch_tile(B, compute_dtype, num_tc)
    batch_tile = _round_up(batch_tile, 128)        # lane-aligned output tiles
    B_pad = _round_up(B, batch_tile)

    # Only wrapper-side data movement: zero-pad the batch when B % tile != 0
    # (the demo picks B == batch_tile, so this is a no-op).
    x_p = x if B_pad == B else jnp.pad(x, ((0, B_pad - B), (0, 0)))

    out_rows = 1 if last_is_vpu else d_out

    # x streamed per batch tile in its NATURAL layout (no feature padding);
    # params are whole-array blocks resident for every grid step; output is a
    # lane-dense (out_rows, batch_tile) tile.
    in_specs = [pl.BlockSpec((batch_tile, d_in), lambda i: (i, 0))]
    for wp, bp in zip(w_prep, b_prep):
        in_specs.append(pl.BlockSpec(wp.shape, lambda i: (0, 0)))
        in_specs.append(pl.BlockSpec(bp.shape, lambda i: (0, 0)))
    out_spec = pl.BlockSpec((out_rows, batch_tile), lambda i: (0, i))

    # VMEM guard (only matters for much larger nets; v7x has 64 MiB physical).
    cp_kwargs = dict(dimension_semantics=("parallel",))
    vmem_est = _estimate_vmem_bytes(prepared, x_p.dtype, x.dtype, batch_tile)
    if vmem_est > (28 << 20):
        cp_kwargs["vmem_limit_bytes"] = int(min(vmem_est + (8 << 20), 60 << 20))

    kernel = _make_critic_kernel(num_layers, last_is_vpu, compute_dtype,
                                 precision)

    fn = pl.pallas_call(
        kernel,
        out_shape=jax.ShapeDtypeStruct((out_rows, B_pad), x.dtype),
        grid_spec=pltpu.PrefetchScalarGridSpec(
            num_scalar_prefetch=0,
            grid=(B_pad // batch_tile,),
            in_specs=in_specs,
            out_specs=out_spec,
        ),
        compiler_params=pltpu.CompilerParams(**cp_kwargs),
    )

    args = [x_p]
    for wp, bp in zip(w_prep, b_prep):
        args.append(wp)
        args.append(bp)
    out_p = fn(*args)                               # (out_rows, B_pad)

    if last_is_vpu:
        # (1, B_pad) -> (B_pad, 1) is a pure reshape (no data movement).
        return out_p.reshape(B_pad, 1)[:B]
    return out_p[:, :B].T


def init_critic_params(key, net_size):
    """Deterministic synthetic init matching nn.Linear (weights stored as (in, out))."""
    weights, biases = [], []
    num_layers = len(net_size) - 1
    for i in range(num_layers):
        key, wk, bk = jax.random.split(key, 3)
        fan_in = net_size[i]
        bound = 1.0 / jnp.sqrt(jnp.float32(fan_in))
        w = jax.random.uniform(
            wk, (net_size[i], net_size[i + 1]), jnp.float32, -bound, bound
        )
        b = jax.random.uniform(bk, (net_size[i + 1],), jnp.float32, -bound, bound)
        weights.append(w)
        biases.append(b)
    return weights, biases


def critic_ref(x, weights, biases):
    """Pure-JAX reference for correctness checking."""
    h = x
    n = len(weights)
    for i in range(n):
        h = h @ weights[i] + biases[i]
        if i < n - 1:
            h = jnp.maximum(h, 0.0)
    return h


if __name__ == "__main__":
    # Critic(net_size=[32, 64, 32, 1]): 3 Linear layers, ReLU between all but last.
    net_size = [32, 64, 32, 1]
    batch = 256  # any B works; non-multiples of the tile are zero-padded

    key = jax.random.PRNGKey(0)
    key, xk = jax.random.split(key)
    x = jax.random.normal(xk, (batch, net_size[0]), jnp.float32)
    weights, biases = init_critic_params(key, net_size)

    # One-time parameter prep (hoisted out of the per-call path).  On v6e/v7x,
    # compute_dtype=jnp.bfloat16 halves streamed/resident bytes; the demo keeps
    # f32 so it matches the f32 reference on every generation.
    prepared = prepare_critic_params(weights, biases, compute_dtype=jnp.float32)

    out = critic_forward(x, prepared)
    out = jax.block_until_ready(out)

    ref = critic_ref(x, weights, biases)
    assert out.shape == (batch, net_size[-1]), out.shape
    assert jnp.allclose(out, ref, atol=1e-3, rtol=1e-3), (
        float(jnp.max(jnp.abs(out - ref)))
    )

    print("KERNEL_OK")
</pallas_src>

<mosaic_0001>
module attributes {stable_mosaic.version = 11 : i64} {
  func.func @kernel(%arg0: i32, %arg1: memref<256x32xf32, #tpu.memory_space<vmem>>, %arg2: memref<64x32xf32, #tpu.memory_space<vmem>>, %arg3: memref<64x1xf32, #tpu.memory_space<vmem>>, %arg4: memref<32x64xf32, #tpu.memory_space<vmem>>, %arg5: memref<32x1xf32, #tpu.memory_space<vmem>>, %arg6: memref<32x1xf32, #tpu.memory_space<vmem>>, %arg7: memref<1x1xf32, #tpu.memory_space<vmem>>, %arg8: memref<1x256xf32, #tpu.memory_space<vmem>>) attributes {dimension_semantics = [#tpu.dimension_semantics<parallel>], iteration_bounds = array<i64: 1>, scalar_prefetch = 0 : i64, scratch_operands = 0 : i64, tpu.core_type = #tpu.core_type<tc>, window_params = [{transform_indices = @transform_0, window_bounds = array<i64: 256, 32>}, {pipeline_mode = #tpu.pipeline_mode<synchronous>, transform_indices = @transform_1, window_bounds = array<i64: 64, 32>}, {pipeline_mode = #tpu.pipeline_mode<synchronous>, transform_indices = @transform_2, window_bounds = array<i64: 64, 1>}, {pipeline_mode = #tpu.pipeline_mode<synchronous>, transform_indices = @transform_3, window_bounds = array<i64: 32, 64>}, {pipeline_mode = #tpu.pipeline_mode<synchronous>, transform_indices = @transform_4, window_bounds = array<i64: 32, 1>}, {pipeline_mode = #tpu.pipeline_mode<synchronous>, transform_indices = @transform_5, window_bounds = array<i64: 32, 1>}, {pipeline_mode = #tpu.pipeline_mode<synchronous>, transform_indices = @transform_6, window_bounds = array<i64: 1, 1>}, {transform_indices = @transform_7, window_bounds = array<i64: 1, 256>}]} {
    %c0 = arith.constant 0 : index
    %c0_0 = arith.constant 0 : index
    %0 = vector.load %arg1[%c0, %c0_0] : memref<256x32xf32, #tpu.memory_space<vmem>>, vector<256x32xf32>
    %c0_1 = arith.constant 0 : index
    %c0_2 = arith.constant 0 : index
    %1 = vector.load %arg2[%c0_1, %c0_2] : memref<64x32xf32, #tpu.memory_space<vmem>>, vector<64x32xf32>
    %c0_3 = arith.constant 0 : index
    %c0_4 = arith.constant 0 : index
    %2 = vector.load %arg3[%c0_3, %c0_4] : memref<64x1xf32, #tpu.memory_space<vmem>>, vector<64x1xf32>
    %cst = arith.constant dense<0.000000e+00> : vector<64x256xf32>
    %3 = tpu.matmul %1, %0, %cst {dimension_numbers = #tpu.dot_dimension_numbers<[1], [1], [0], [0], [0, 0, 1, 0], [], []>} : vector<64x32xf32>, vector<256x32xf32>, vector<64x256xf32> -> vector<64x256xf32>
    %4 = vector.broadcast %2 : vector<64x1xf32> to vector<64x256xf32>
    %5 = arith.addf %3, %4 : vector<64x256xf32>
    %cst_5 = arith.constant 0.000000e+00 : f32
    %6 = vector.broadcast %cst_5 : f32 to vector<64x256xf32>
    %7 = arith.maximumf %5, %6 : vector<64x256xf32>
    %c0_6 = arith.constant 0 : index
    %c0_7 = arith.constant 0 : index
    %8 = vector.load %arg4[%c0_6, %c0_7] : memref<32x64xf32, #tpu.memory_space<vmem>>, vector<32x64xf32>
    %c0_8 = arith.constant 0 : index
    %c0_9 = arith.constant 0 : index
    %9 = vector.load %arg5[%c0_8, %c0_9] : memref<32x1xf32, #tpu.memory_space<vmem>>, vector<32x1xf32>
    %cst_10 = arith.constant dense<0.000000e+00> : vector<32x256xf32>
    %10 = tpu.matmul %8, %7, %cst_10 {dimension_numbers = #tpu.dot_dimension_numbers<[1], [0], [0], [1], [0, 0, 1, 1], [], []>} : vector<32x64xf32>, vector<64x256xf32>, vector<32x256xf32> -> vector<32x256xf32>
    %11 = vector.broadcast %9 : vector<32x1xf32> to vector<32x256xf32>
    %12 = arith.addf %10, %11 : vector<32x256xf32>
    %cst_11 = arith.constant 0.000000e+00 : f32
    %13 = vector.broadcast %cst_11 : f32 to vector<32x256xf32>
    %14 = arith.maximumf %12, %13 : vector<32x256xf32>
    %c0_12 = arith.constant 0 : index
    %c0_13 = arith.constant 0 : index
    %15 = vector.load %arg6[%c0_12, %c0_13] : memref<32x1xf32, #tpu.memory_space<vmem>>, vector<32x1xf32>
    %c0_14 = arith.constant 0 : index
    %c0_15 = arith.constant 0 : index
    %16 = vector.load %arg7[%c0_14, %c0_15] : memref<1x1xf32, #tpu.memory_space<vmem>>, vector<1x1xf32>
    %17 = vector.broadcast %15 : vector<32x1xf32> to vector<32x256xf32>
    %18 = arith.mulf %14, %17 : vector<32x256xf32>
    %cst_16 = arith.constant dense<0.000000e+00> : vector<256xf32>
    %19 = vector.multi_reduction <add>, %18, %cst_16 [0] : vector<32x256xf32> to vector<256xf32>
    %20 = vector.shape_cast %19 : vector<256xf32> to vector<1x256xf32>
    %21 = vector.broadcast %16 : vector<1x1xf32> to vector<1x256xf32>
    %22 = arith.addf %20, %21 : vector<1x256xf32>
    %c0_17 = arith.constant 0 : index
    %c0_18 = arith.constant 0 : index
    %23 = vector.load %arg8[%c0_17, %c0_18] : memref<1x256xf32, #tpu.memory_space<vmem>>, vector<1x256xf32>
    tpu.vector_store %arg8[%c0_17, %c0_18], %22 {strides = array<i32>} : memref<1x256xf32, #tpu.memory_space<vmem>>, vector<1x256xf32>,
    return
  }
  func.func @transform_0(%arg0: i32) -> (i32, i32) {
    %c0_i32 = arith.constant 0 : i32
    %c0_i32_0 = arith.constant 0 : i32
    return %arg0, %c0_i32 : i32, i32
  }
  func.func @transform_1(%arg0: i32) -> (i32, i32) {
    %c0_i32 = arith.constant 0 : i32
    %c0_i32_0 = arith.constant 0 : i32
    %c0_i32_1 = arith.constant 0 : i32
    return %c0_i32, %c0_i32_0 : i32, i32
  }
  func.func @transform_2(%arg0: i32) -> (i32, i32) {
    %c0_i32 = arith.constant 0 : i32
    %c0_i32_0 = arith.constant 0 : i32
    %c0_i32_1 = arith.constant 0 : i32
    return %c0_i32, %c0_i32_0 : i32, i32
  }
  func.func @transform_3(%arg0: i32) -> (i32, i32) {
    %c0_i32 = arith.constant 0 : i32
    %c0_i32_0 = arith.constant 0 : i32
    %c0_i32_1 = arith.constant 0 : i32
    return %c0_i32, %c0_i32_0 : i32, i32
  }
  func.func @transform_4(%arg0: i32) -> (i32, i32) {
    %c0_i32 = arith.constant 0 : i32
    %c0_i32_0 = arith.constant 0 : i32
    %c0_i32_1 = arith.constant 0 : i32
    return %c0_i32, %c0_i32_0 : i32, i32
  }
  func.func @transform_5(%arg0: i32) -> (i32, i32) {
    %c0_i32 = arith.constant 0 : i32
    %c0_i32_0 = arith.constant 0 : i32
    %c0_i32_1 = arith.constant 0 : i32
    return %c0_i32, %c0_i32_0 : i32, i32
  }
  func.func @transform_6(%arg0: i32) -> (i32, i32) {
    %c0_i32 = arith.constant 0 : i32
    %c0_i32_0 = arith.constant 0 : i32
    %c0_i32_1 = arith.constant 0 : i32
    return %c0_i32, %c0_i32_0 : i32, i32
  }
  func.func @transform_7(%arg0: i32) -> (i32, i32) {
    %c0_i32 = arith.constant 0 : i32
    %c0_i32_0 = arith.constant 0 : i32
    return %c0_i32, %arg0 : i32, i32
  }
}

</mosaic_0001>

<bundles_post_ra>
// kernel: tpu_custom_call.1
= control target key start
LH: loop header
LB: loop body
LE: loop exit
PB: predicated region body
PF: predicated region fallthrough
CT: control target
= control target key end

     0   :  { %s1091_s0 = inlined_call_operand.vmem [shape: f32[256,32], index: 0, kind: input, shape index: {}]   ;;  %s1092_s1 = inlined_call_operand.vmem [shape: f32[64,32], index: 1, kind: input, shape index: {}]   ;;  %s1093_s2 = inlined_call_operand.vmem [shape: f32[64,1], index: 2, kind: input, shape index: {}]   ;;  %s1094_s3 = inlined_call_operand.vmem [shape: f32[32,64], index: 3, kind: input, shape index: {}]   ;;  %s1095_s4 = inlined_call_operand.vmem [shape: f32[32,1], index: 4, kind: input, shape index: {}]   ;;  %s1096_s5 = inlined_call_operand.vmem [shape: f32[32,1], index: 5, kind: input, shape index: {}]   ;;  %s1097_s6 = inlined_call_operand.<no memory space> [shape: f32[1,1], index: 6, kind: input, shape index: {}]   ;;  %s1098_s7 = inlined_call_operand.hbm [shape: f32[1,256], index: 7, kind: output, shape index: {}]  }
   0x1   :  { %v12_v0 = vstv %s1097_s6 }
   0x2   :  { %13 = vst [vmem:[#allocation2] sm:$0x1] %v12_v0 }
   0x3   :  { %v45_v1 = vld [vmem:[%s1091_s0 + $0x80] sm:$0xff]  ;;  %v46_v2 = vld [vmem:[%s1091_s0 + $0x88] sm:$0xff]  ;;  %vm117_vm0 = vcmask 261120   ;;  %v47_v7 = vld [vmem:[%s1091_s0 + $0x90] sm:$0xff]  ;;  %v790_v8 = vmov 0  }
   0x4   :  { %v29_v3 = vld [vmem:[%s1091_s0] sm:$0xff]  ;;  %v696_v4 = vpack.c.bf16 %v46_v2, %v45_v1  ;;  %vm848_vm1 = vmpackc.low %vm117_vm0, %vm117_vm0  ;;  %v30_v6 = vld [vmem:[%s1091_s0 + $0x8] sm:$0xff]  ;;  %764 = vset.pattern.permute.xlu0 %v790_v8  ;;  %765 = vset.pattern.permute.xlu1 %v790_v8 }
   0x5   :  { %v699_v9 = vpack.c.bf16 %v30_v6, %v29_v3  ;;  %v48_v10 = vld [vmem:[%s1091_s0 + $0x98] sm:$0xff]  ;;  %v31_v12 = vld [vmem:[%s1091_s0 + $0x10] sm:$0xff]  ;;  %v49_v14 = vld [vmem:[%s1091_s0 + $0xa0] sm:$0xff] }
   0x6   :  { %698 = vmatprep.subr.msk.bf16.mxu0 %vm848_vm1, %v696_v4  ;;  %v702_v11 = vpack.c.bf16 %v48_v10, %v47_v7  ;;  %v32_v13 = vld [vmem:[%s1091_s0 + $0x18] sm:$0xff]  ;;  %v50_v15 = vld [vmem:[%s1091_s0 + $0xa8] sm:$0xff]  ;;  %v882_v18 = vld [vmem:[%s1092_s1] sm:$0xff] }
   0x7   :  { %701 = vmatpush3.bf16.xpose.msk.msra.mxu0 %vm848_vm1, %v699_v9  ;;  %v705_v16 = vpack.c.bf16 %v32_v13, %v31_v12  ;;  %v708_v17 = vpack.c.bf16 %v50_v15, %v49_v14  ;;  %680 = vmatprep.mubr.msk.f32.mxu0 %vm117_vm0, %v882_v18  ;;  %v33_v19 = vld [vmem:[%s1091_s0 + $0x20] sm:$0xff]  ;;  %v34_v20 = vld [vmem:[%s1091_s0 + $0x28] sm:$0xff]  ;;  %v51_v22 = vld [vmem:[%s1091_s0 + $0xb0] sm:$0xff] }
   0x8   :  { %704 = vmatprep.subr.msk.bf16.mxu0 %vm848_vm1, %v702_v11  ;;  %v69_v21 = vld [vmem:[%s1093_s2] sm:$0xff]  ;;  %v52_v23 = vld [vmem:[%s1091_s0 + $0xb8] sm:$0xff]  ;;  %v71_v24 = vld [vmem:[%s1093_s2 + $0x10] sm:$0xff]  ;;  %v711_v26 = vpack.c.bf16 %v34_v20, %v33_v19 }
   0x9   :  { %79 = vperm.xlu0 %764, %v69_v21   ;;  %v70_v25 = vld [vmem:[%s1093_s2 + $0x8] sm:$0xff]  ;;  %89 = vperm.xlu1 %765, %v71_v24   ;;  %v72_v27 = vld [vmem:[%s1093_s2 + $0x18] sm:$0xff]  ;;  %v714_v28 = vpack.c.bf16 %v52_v23, %v51_v22  ;;  %v73_v29 = vld [vmem:[%s1093_s2 + $0x20] sm:$0xff] }
   0xd   :  { %84 = vperm.xlu0 %764, %v70_v25   ;;  %94 = vperm.xlu1 %765, %v72_v27  }
   0xf   :  { %707 = vmatpush3.bf16.xpose.msk.msra.mxu0 %vm848_vm1, %v705_v16 }
  0x10   :  { %710 = vmatprep.subr.msk.bf16.mxu0 %vm848_vm1, %v708_v17 }
  0x11   :  { %14 = vsyncpa [#allocation4], 0  ;;  %v74_v30 = vld [vmem:[%s1093_s2 + $0x28] sm:$0xff]  ;;  %v35_v31 = vld [vmem:[%s1091_s0 + $0x30] sm:$0xff]  ;;  %99 = vperm.xlu0 %764, %v73_v29   ;;  %v791_v12 = vmov 0.0   ;;  %vm395_vm2 = vcmask 523264  }
  0x12   :  { %v36_v32 = vld [vmem:[%s1091_s0 + $0x38] sm:$0xff]  ;;  %v53_v33 = vld [vmem:[%s1091_s0 + $0xc0] sm:$0xff]  ;;  %v54_v34 = vld [vmem:[%s1091_s0 + $0xc8] sm:$0xff]  ;;  %104 = vperm.xlu1 %765, %v74_v30   ;;  %472 = vmatprep.mubr.f32.mxu1 %v791_v12 }
  0x13   :  { %v75_v35 = vld [vmem:[%s1093_s2 + $0x30] sm:$0xff]  ;;  %v717_v36 = vpack.c.bf16 %v36_v32, %v35_v31  ;;  %v76_v37 = vld [vmem:[%s1093_s2 + $0x38] sm:$0xff]  ;;  %v720_v38 = vpack.c.bf16 %v54_v34, %v53_v33  ;;  %v371_v39 = vld [vmem:[%s1095_s4] sm:$0xff] }
  0x14   :  { %v372_v40 = vld [vmem:[%s1095_s4 + $0x8] sm:$0xff]  ;;  %v37_v41 = vld [vmem:[%s1091_s0 + $0x40] sm:$0xff]  ;;  %v55_v43 = vld [vmem:[%s1091_s0 + $0xd0] sm:$0xff] }
  0x15   :  { %109 = vperm.xlu0 %764, %v75_v35   ;;  %v38_v42 = vld [vmem:[%s1091_s0 + $0x48] sm:$0xff]  ;;  %v56_v44 = vld [vmem:[%s1091_s0 + $0xd8] sm:$0xff]  ;;  %v373_v45 = vld [vmem:[%s1095_s4 + $0x10] sm:$0xff] }
  0x16   :  { %114 = vperm.xlu1 %765, %v76_v37   ;;  %v723_v46 = vpack.c.bf16 %v38_v42, %v37_v41  ;;  %v374_v47 = vld [vmem:[%s1095_s4 + $0x18] sm:$0xff]  ;;  %v726_v48 = vpack.c.bf16 %v56_v44, %v55_v43  ;;  %v505_v49 = vld [vmem:[%s1096_s5] sm:$0xff]  ;;  %v506_v50 = vld [vmem:[%s1096_s5 + $0x8] sm:$0xff] }
  0x17   :  { %713 = vmatpush3.bf16.xpose.msk.msra.mxu0 %vm848_vm1, %v711_v26  ;;  %v39_v51 = vld [vmem:[%s1091_s0 + $0x50] sm:$0xff]  ;;  %v40_v52 = vld [vmem:[%s1091_s0 + $0x58] sm:$0xff]  ;;  %v57_v53 = vld [vmem:[%s1091_s0 + $0xe0] sm:$0xff] }
  0x18   :  { %716 = vmatprep.subr.msk.bf16.mxu0 %vm848_vm1, %v714_v28  ;;  %v58_v54 = vld [vmem:[%s1091_s0 + $0xe8] sm:$0xff]  ;;  %v507_v55 = vld [vmem:[%s1096_s5 + $0x10] sm:$0xff]  ;;  %v729_v56 = vpack.c.bf16 %v40_v52, %v39_v51  ;;  %v508_v57 = vld [vmem:[%s1096_s5 + $0x18] sm:$0xff] }
  0x19   :  { %377 = vperm.xlu0 %764, %v371_v39   ;;  %v732_v58 = vpack.c.bf16 %v58_v54, %v57_v53  ;;  %v509_v59 = vld [vmem:[#allocation2] sm:$0x1]  ;;  %v42_v61 = vld [vmem:[%s1091_s0 + $0x68] sm:$0xff]  ;;  %v59_v62 = vld [vmem:[%s1091_s0 + $0xf0] sm:$0xff] }
  0x1a   :  { %382 = vperm.xlu1 %765, %v372_v40   ;;  %v41_v60 = vld [vmem:[%s1091_s0 + $0x60] sm:$0xff]  ;;  %v60_v63 = vld [vmem:[%s1091_s0 + $0xf8] sm:$0xff]  ;;  %v43_v2 = vld [vmem:[%s1091_s0 + $0x70] sm:$0xff] }
  0x1b   :  { %v735_v0 = vpack.c.bf16 %v42_v61, %v41_v60  ;;  %v738_v1 = vpack.c.bf16 %v60_v63, %v59_v62  ;;  %v44_v3 = vld [vmem:[%s1091_s0 + $0x78] sm:$0xff]  ;;  %v62_v6 = vld [vmem:[%s1092_s1 + $0x8] sm:$0xff]  ;;  %v63_v7 = vld [vmem:[%s1092_s1 + $0x10] sm:$0xff] }
  0x1c   :  { %v741_v4 = vpack.c.bf16 %v44_v3, %v43_v2  ;;  %v64_v5 = vld [vmem:[%s1092_s1 + $0x18] sm:$0xff]  ;;  %v65_v8 = vld [vmem:[%s1092_s1 + $0x20] sm:$0xff]  ;;  %v66_v9 = vld [vmem:[%s1092_s1 + $0x28] sm:$0xff] }
  0x1d   :  { %387 = vperm.xlu0 %764, %v373_v45   ;;  %v67_v10 = vld [vmem:[%s1092_s1 + $0x30] sm:$0xff]  ;;  %v68_v11 = vld [vmem:[%s1092_s1 + $0x38] sm:$0xff] }
  0x1e   :  { %392 = vperm.xlu1 %765, %v374_v47  }
  0x1f   :  { %719 = vmatpush3.bf16.xpose.msk.msra.mxu0 %vm848_vm1, %v717_v36 }
  0x20   :  { %722 = vmatprep.subr.msk.bf16.mxu0 %vm848_vm1, %v720_v38 }
  0x21   :  { %512 = vperm.xlu0 %764, %v505_v49  }
  0x22   :  { %517 = vperm.xlu1 %765, %v506_v50  }
  0x25   :  { %522 = vperm.xlu0 %764, %v507_v55  }
  0x26   :  { %527 = vperm.xlu1 %765, %v508_v57  }
  0x27   :  { %725 = vmatpush3.bf16.xpose.msk.msra.mxu0 %vm848_vm1, %v723_v46 }
  0x28   :  { %728 = vmatprep.subr.msk.bf16.mxu0 %vm848_vm1, %v726_v48 }
  0x29   :  { %558 = vperm.xlu0 %764, %v509_v59  }
  0x2f   :  { %731 = vmatpush3.bf16.xpose.msk.msra.mxu0 %vm848_vm1, %v729_v56 }
  0x30   :  { %734 = vmatprep.subr.msk.bf16.mxu0 %vm848_vm1, %v732_v58 }
  0x37   :  { %737 = vmatpush3.bf16.xpose.msk.msra.mxu0 %vm848_vm1, %v735_v0 }
  0x38   :  { %740 = vmatprep.subr.msk.bf16.mxu0 %vm848_vm1, %v738_v1 }
  0x3f   :  { %743 = vmatpush3.bf16.xpose.msk.msra.mxu0 %vm848_vm1, %v741_v4 }
  0x46   :  { %681 = vmatmul.mubr.msk.f32.vlgmr.msra.gmra.mrb[0].mxu0 %vm117_vm0, %v882_v18 }
  0x47   :  { %682 = vmatprep.mubr.msk.f32.mxu0 %vm117_vm0, %v62_v6 }
  0x4a   :  { %683 = vmatmul.mubr.msk.f32.gmra.mrb[2].mxu0 %vm117_vm0, %v62_v6 }
  0x4b   :  { %684 = vmatprep.mubr.msk.f32.mxu0 %vm117_vm0, %v63_v7 }
  0x4e   :  { %685 = vmatmul.mubr.msk.f32.gmra.mrb[4].mxu0 %vm117_vm0, %v63_v7 }
  0x4f   :  { %686 = vmatprep.mubr.msk.f32.mxu0 %vm117_vm0, %v64_v5 }
  0x52   :  { %687 = vmatmul.mubr.msk.f32.gmra.mrb[6].mxu0 %vm117_vm0, %v64_v5 }
  0x53   :  { %688 = vmatprep.mubr.msk.f32.mxu0 %vm117_vm0, %v65_v8 }
  0x56   :  { %689 = vmatmul.mubr.msk.f32.gmra.mrb[8].mxu0 %vm117_vm0, %v65_v8 }
  0x57   :  { %690 = vmatprep.mubr.msk.f32.mxu0 %vm117_vm0, %v66_v9 }
  0x5a   :  { %691 = vmatmul.mubr.msk.f32.gmra.mrb[10].mxu0 %vm117_vm0, %v66_v9 }
  0x5b   :  { %692 = vmatprep.mubr.msk.f32.mxu0 %vm117_vm0, %v67_v10 }
  0x5e   :  { %693 = vmatmul.mubr.msk.f32.gmra.mrb[12].mxu0 %vm117_vm0, %v67_v10 }
  0x5f   :  { %694 = vmatprep.mubr.msk.f32.mxu0 %vm117_vm0, %v68_v11 }
  0x62   :  { %695 = vmatmul.mubr.msk.f32.gmra.mrb[14].mxu0 %vm117_vm0, %v68_v11 }
  0x88   :  { %v80_v13 = vpop.permute.xlu0 %79  ;;  %v90_v22 = vpop.permute.xlu1 %89 }
  0x8c   :  { %v85_v17 = vpop.permute.xlu0 %84  ;;  %v95_v33 = vpop.permute.xlu1 %94 }
  0x90   :  { %v100_v46 = vpop.permute.xlu0 %99 }
  0x91   :  { %v105_v49 = vpop.permute.xlu1 %104 }
  0x94   :  { %v110_v62 = vpop.permute.xlu0 %109 }
  0x95   :  { %v115_v1 = vpop.permute.xlu1 %114 }
 0x119   :  { %v304_v14 = vpop.f32.mrb[0].mxu0 }
 0x11a   :  { %v306_v15 = vpop.f32.mrb[1].mxu0  ;;  %v305_v16 = vadd.f32 %v304_v14, %v80_v13  ;;  %v367_v14 = vld [vmem:[%s1094_s3] sm:$0xff] }
 0x11b   :  { %v307_v18 = vadd.f32 %v306_v15, %v80_v13  ;;  %v368_v15 = vld [vmem:[%s1094_s3 + $0x8] sm:$0xff] }
 0x11c   :  { %v351_v24 = vmax.f32 %v305_v16, 0.0  ;;  %v369_v16 = vld [vmem:[%s1094_s3 + $0x10] sm:$0xff] }
 0x11d   :  { %v310_v19 = vpop.f32.mrb[2].mxu0  ;;  %v352_v26 = vmax.f32 %v307_v18, 0.0  ;;  %v378_v18 = vpop.permute.xlu0 %377 }
 0x11e   :  { %v311_v20 = vadd.f32 %v310_v19, %v85_v17  ;;  %v312_v21 = vpop.f32.mrb[3].mxu0  ;;  %v383_v19 = vpop.permute.xlu1 %382 }
 0x11f   :  { %v313_v23 = vadd.f32 %v312_v21, %v85_v17  ;;  %v370_v17 = vld [vmem:[%s1094_s3 + $0x18] sm:$0xff]  ;;  %s793_s3 = smov [#allocation3]  }
 0x120   :  { %v353_v25 = vmax.f32 %v311_v20, 0.0  ;;  %s596_s5 = sshll.u32 %s793_s3, 4  ;;  %s597_s5 = int_to_ptr.vmem [resolvable:$true] %s596_s5 }
 0x121   :  { %v354_v27 = vmax.f32 %v313_v23, 0.0  ;;  %v316_v28 = vpop.f32.mrb[4].mxu0  ;;  %v388_v20 = vpop.permute.xlu0 %387  ;;  %s766_s18 = scalar_lea.vmem %s597_s5, 32  ;;  %p771_p1 = scmp.lt.s32.totalorder %s597_s5, %s597_s5 }
 0x122   :  { %v318_v29 = vpop.f32.mrb[5].mxu0  ;;  %v746_v30 = vpack.c.bf16 %v353_v25, %v351_v24  ;;  %v317_v32 = vadd.f32 %v316_v28, %v90_v22  ;;  %v393_v24 = vpop.permute.xlu1 %392  ;;  %p767_p0 = scmp.ne.s32.totalorder %s597_s5, %s766_s18  ;;  %p772_p2 = scmp.lt.s32.totalorder %s766_s18, %s766_s18 }
 0x123   :  { %v744_v31 = vpack.c.bf16 %v354_v27, %v352_v26  ;;  %v319_v34 = vadd.f32 %v318_v29, %v90_v22 }
 0x124   :  { %v355_v39 = vmax.f32 %v317_v32, 0.0  ;;  %p773_p3 = por %p772_p2, %p771_p1 }
 0x125   :  { %v322_v35 = vpop.f32.mrb[6].mxu0  ;;  %745 = vmatprep.subr.bf16.mxu1 %v744_v31  ;;  %v356_v41 = vmax.f32 %v319_v34, 0.0 }
 0x126   :  { %v323_v36 = vadd.f32 %v322_v35, %v95_v33  ;;  %v324_v37 = vpop.f32.mrb[7].mxu0  ;;  %747 = vmatpush1.bf16.msra.mxu1 %v746_v30  ;;  %v513_v30 = vpop.permute.xlu0 %512  ;;  %p774_p4 = pnand %p773_p3, %p767_p0 }
 0x127   :  { %v325_v38 = vadd.f32 %v324_v37, %v95_v33  ;;  %v518_v33 = vpop.permute.xlu1 %517 }
 0x128   :  { %v357_v40 = vmax.f32 %v323_v36, 0.0 }
 0x129   :  { %v358_v42 = vmax.f32 %v325_v38, 0.0  ;;  %v328_v43 = vpop.f32.mrb[8].mxu0 }
 0x12a   :  { %v750_v44 = vpack.c.bf16 %v357_v40, %v355_v39  ;;  %v330_v45 = vpop.f32.mrb[9].mxu0  ;;  %v329_v48 = vadd.f32 %v328_v43, %v100_v46 }
 0x12b   :  { %v748_v47 = vpack.c.bf16 %v358_v42, %v356_v41  ;;  %v331_v50 = vadd.f32 %v330_v45, %v100_v46  ;;  %v523_v45 = vpop.permute.xlu0 %522 }
 0x12c   :  { %v359_v55 = vmax.f32 %v329_v48, 0.0 }
 0x12d   :  { %v334_v51 = vpop.f32.mrb[10].mxu0  ;;  %749 = vmatprep.subr.bf16.mxu1 %v748_v47  ;;  %v360_v57 = vmax.f32 %v331_v50, 0.0 }
 0x12e   :  { %v335_v52 = vadd.f32 %v334_v51, %v105_v49  ;;  %v336_v53 = vpop.f32.mrb[11].mxu0  ;;  %751 = vmatpush1.bf16.msra.mxu1 %v750_v44 }
 0x12f   :  { %v337_v54 = vadd.f32 %v336_v53, %v105_v49 }
 0x130   :  { %v361_v56 = vmax.f32 %v335_v52, 0.0 }
 0x131   :  { %v362_v58 = vmax.f32 %v337_v54, 0.0  ;;  %v340_v59 = vpop.f32.mrb[12].mxu0 }
 0x132   :  { %v754_v60 = vpack.c.bf16 %v361_v56, %v359_v55  ;;  %v342_v61 = vpop.f32.mrb[13].mxu0  ;;  %v341_v0 = vadd.f32 %v340_v59, %v110_v62  ;;  %v528_v56 = vpop.permute.xlu1 %527 }
 0x133   :  { %v752_v63 = vpack.c.bf16 %v362_v58, %v360_v57  ;;  %v343_v2 = vadd.f32 %v342_v61, %v110_v62  ;;  %v561_v61 = vlaneseq }
 0x134   :  { %v363_v5 = vmax.f32 %v341_v0, 0.0 }
 0x135   :  { %v346_v3 = vpop.f32.mrb[14].mxu0  ;;  %753 = vmatprep.subr.bf16.mxu1 %v752_v63  ;;  %v364_v9 = vmax.f32 %v343_v2, 0.0  ;;  %v562_v2 = vshrl.u32 %v561_v61, 7  ;;  %vm587_vm3 = vcmp.lt.s32.totalorder %v561_v61, 256 }
 0x136   :  { %v347_v4 = vadd.f32 %v346_v3, %v115_v1  ;;  %v348_v6 = vpop.f32.mrb[15].mxu0  ;;  %755 = vmatpush1.bf16.msra.mxu1 %v754_v60 }
 0x137   :  { %v349_v7 = vadd.f32 %v348_v6, %v115_v1 }
 0x138   :  { %v365_v8 = vmax.f32 %v347_v4, 0.0 }
 0x139   :  { %v366_v10 = vmax.f32 %v349_v7, 0.0 }
 0x13a   :  { %v758_v11 = vpack.c.bf16 %v365_v8, %v363_v5  ;;  %v792_v5 = vmov 1966171168  }
 0x13b   :  { %v756_v13 = vpack.c.bf16 %v366_v10, %v364_v9  ;;  %v571_v8 = vunpack.c.l.s4 %v792_v5  ;;  %v563_v9 = vsub.s32 0, %v562_v2 }
 0x13d   :  { %757 = vmatprep.subr.bf16.mxu1 %v756_v13 }
 0x13e   :  { %759 = vmatpush1.bf16.msra.mxu1 %v758_v11  ;;  %v559_v11 = vpop.permute.xlu0 %558 }
 0x141   :  { %644 = vmatmul.mubr.msk.f32.vlgmr.msra.gmra.mrb[0].mxu1 %vm395_vm2, %v367_v14 }
 0x142   :  { %478 = vmatprep.mubr.f32.mxu1 %v791_v12 }
 0x145   :  { %645 = vmatmul.mubr.msk.f32.gmra.mrb[2].mxu1 %vm395_vm2, %v368_v15 }
 0x146   :  { %484 = vmatprep.mubr.f32.mxu1 %v791_v12 }
 0x149   :  { %646 = vmatmul.mubr.msk.f32.gmra.mrb[4].mxu1 %vm395_vm2, %v369_v16  ;;  %v572_v16 = vunpack.c.0.s8 %v571_v8 }
 0x14a   :  { %490 = vmatprep.mubr.f32.mxu1 %v791_v12 }
 0x14d   :  { %647 = vmatmul.mubr.msk.f32.gmra.mrb[6].mxu1 %vm395_vm2, %v370_v17  ;;  %v564_v17 = vrot.slane %v559_v11, %v563_v9 }
 0x214   :  { %v474_v21 = vpop.f32.mrb[0].mxu1 }
 0x215   :  { %v475_v22 = vadd.f32 %v474_v21, %v378_v18  ;;  %v476_v23 = vpop.f32.mrb[1].mxu1 }
 0x216   :  { %v477_v25 = vadd.f32 %v476_v23, %v378_v18 }
 0x217   :  { %v497_v27 = vmax.f32 %v475_v22, 0.0  ;;  %v575_v22 = vsub.s32 %v572_v16, %v562_v2 }
 0x218   :  { %v480_v26 = vpop.f32.mrb[2].mxu1  ;;  %v498_v31 = vmax.f32 %v477_v25, 0.0 }
 0x219   :  { %v481_v28 = vadd.f32 %v480_v26, %v383_v19  ;;  %v482_v29 = vpop.f32.mrb[3].mxu1  ;;  %v530_v36 = vmul.f32 %v513_v30, %v497_v27 }
 0x21a   :  { %v483_v12 = vadd.f32 %v482_v29, %v383_v19  ;;  %v531_v40 = vmul.f32 %v513_v30, %v498_v31 }
 0x21b   :  { %v499_v32 = vmax.f32 %v481_v28, 0.0 }
 0x21c   :  { %v500_v34 = vmax.f32 %v483_v12, 0.0  ;;  %v486_v35 = vpop.f32.mrb[4].mxu1 }
 0x21d   :  { %v532_v37 = vmul.f32 %v518_v33, %v499_v32  ;;  %v487_v38 = vadd.f32 %v486_v35, %v388_v20  ;;  %v488_v39 = vpop.f32.mrb[5].mxu1 }
 0x21e   :  { %v533_v41 = vmul.f32 %v518_v33, %v500_v34  ;;  %v489_v42 = vadd.f32 %v488_v39, %v388_v20 }
 0x21f   :  { %v538_v43 = vadd.f32 %v532_v37, %v530_v36  ;;  %v501_v44 = vmax.f32 %v487_v38, 0.0 }
 0x220   :  { %v547_v46 = vadd.f32 %v533_v41, %v531_v40  ;;  %v502_v47 = vmax.f32 %v489_v42, 0.0  ;;  %v492_v48 = vpop.f32.mrb[6].mxu1 }
 0x221   :  { %v534_v49 = vmul.f32 %v523_v45, %v501_v44  ;;  %v493_v50 = vadd.f32 %v492_v48, %v393_v24  ;;  %v494_v51 = vpop.f32.mrb[7].mxu1 }
 0x222   :  { %v535_v52 = vmul.f32 %v523_v45, %v502_v47  ;;  %v495_v53 = vadd.f32 %v494_v51, %v393_v24 }
 0x223   :  { %v539_v54 = vadd.f32 %v538_v43, %v534_v49  ;;  %v503_v55 = vmax.f32 %v493_v50, 0.0 }
 0x224   :  { %v548_v57 = vadd.f32 %v547_v46, %v535_v52  ;;  %v504_v58 = vmax.f32 %v495_v53, 0.0 }
 0x225   :  { %v536_v59 = vmul.f32 %v528_v56, %v503_v55 }
 0x226   :  { %v537_v60 = vmul.f32 %v528_v56, %v504_v58 }
 0x227   :  { %v540_v62 = vadd.f32 %v539_v54, %v536_v59 }
 0x228   :  { %v549_v63 = vadd.f32 %v548_v57, %v537_v60 }
 0x229   :  { %v541_v0 = vrot.slane %v540_v62, 4 }
 0x22a   :  { %v550_v1 = vrot.slane %v549_v63, 4 }
 0x22b   :  { %v542_v3 = vadd.f32 %v541_v0, %v540_v62 }
 0x22c   :  { %v551_v4 = vadd.f32 %v550_v1, %v549_v63 }
 0x22d   :  { %v543_v6 = vrot.slane %v542_v3, 2 }
 0x22e   :  { %v552_v7 = vrot.slane %v551_v4, 2 }
 0x22f   :  { %v544_v10 = vadd.f32 %v543_v6, %v542_v3 }
 0x230   :  { %v553_v13 = vadd.f32 %v552_v7, %v551_v4 }
 0x231   :  { %v545_v14 = vrot.slane %v544_v10, 1 }
 0x232   :  { %v554_v15 = vrot.slane %v553_v13, 1 }
 0x233   :  { %v546_v18 = vadd.f32 %v545_v14, %v544_v10 }
 0x234   :  { %v555_v19 = vadd.f32 %v554_v15, %v553_v13 }
 0x235   :  { %v565_v20 = vadd.f32 %v564_v17, %v546_v18 }
 0x236   :  { %v566_v21 = vadd.f32 %v564_v17, %v555_v19 }
 0x238   :  { %v569_v23 = vcombine.low %v565_v20, %v566_v21 }
 0x23a   :  { %v576_v24 = vrot.slane %v569_v23, %v575_v22 }
 0x23c   :  { %v583_v25 = vrot.slane %v576_v24, %v575_v22 }
 0x23e   :  { %589 = vst.msk [vmem:[#allocation3] sm:$0x3] %vm587_vm3, %v583_v25 }
 0x23f   :  { %777 = shalt.err (!%p774_p4)
}
 0x240   :  { %s778_s21 = scalar_lea.hbm %s1098_s7, 32 }
 0x241   :  { %p779_p5 = scmp.ne.s32.totalorder %s1098_s7, %s778_s21  ;;  %p782_p6 = scmp.lt.u32.totalorder %s778_s21, %s1098_s7 }
 0x243   :  { %p784_p7 = pnand %p782_p6, %p779_p5 }
 0x245   :  { %787 = shalt.err (!%p784_p7)
}
 0x246   :  { %599 = dma.vmem_to_hbm [thread:$0]  %s597_s5, 32, %s1098_s7, [#allocation4]  }
 0x247   :  { %788 = dma.done.wait [#allocation4], 32  }
 0x248   :  { %789 = vsyncadd [#allocation4], 4294967264 }
 0x249   :  { %603 = vsyncpa [#allocation4], 1 }

</bundles_post_ra>
